<compile_context>
chip_gen: v6e
topology: v6e:2x2x1
jax: 0.10.0
libtpu: 0.0.40
codegen_flags: <defaults>
</compile_context>

<pallas_src>
import jax
import jax.numpy as jnp
from jax.experimental import pallas as pl
from jax.experimental.pallas import tpu as pltpu


# ---------------------------------------------------------------------------
# Pallas kernel: whole batch, whole sequence, one invocation.
# ---------------------------------------------------------------------------
def revert_kernel(val_ref, keep_ref, idx_ref, mtok_ref, pos_ref, out_ref):
    val = val_ref[...]            # (B, Lr, D)   remaining (un-masked) tokens
    keep = keep_ref[...]          # (B, Lr)      1.0 = keep token, 0.0 = use mask_token
    idx = idx_ref[...]            # (B, Lf)      int32 revert indices
    mtok = mtok_ref[...]          # (1, D)       mask token
    pos = pos_ref[...]            # (Lf, D)      positional encoding slice

    B, Lr, _ = val.shape
    Lf = idx.shape[1]

    # sel[b, j, i] = 1.0  iff  revert_idx[b, j] == i  and  remain_padding_mask[b, i] == 1
    iota = jax.lax.broadcasted_iota(jnp.int32, (B, Lf, Lr), 2)
    onehot = (idx[:, :, None] == iota).astype(jnp.float32)        # (B, Lf, Lr)
    sel = onehot * keep[:, None, :]                               # (B, Lf, Lr)

    # Gather-by-matmul: one small batched MXU contraction instead of a dynamic gather.
    gathered = jnp.einsum("bji,bid->bjd", sel, val,
                          preferred_element_type=jnp.float32)      # (B, Lf, D)

    # covered == 1 where the index hit a kept remaining token, else 0 -> mask_token.
    covered = jnp.sum(sel, axis=-1, keepdims=True)                 # (B, Lf, 1)

    out_ref[...] = gathered + (1.0 - covered) * mtok[None, :, :] + pos[None, :, :]


# ---------------------------------------------------------------------------
# Module-level forward (glue: dict handling, dtype prep, pos_enc slicing).
# ---------------------------------------------------------------------------
def revert_pallas(key, val, padding_mask_dict, idx_dict, mask_token, pos_enc):
    B, Lr, D = val.shape
    mask = padding_mask_dict[f"{key}_remain_padding_mask"]
    idx = idx_dict[f"{key}_revert_idx"].astype(jnp.int32)
    Lf = idx.shape[1]

    keep = (mask == 1).astype(jnp.float32)                # (B, Lr)
    mtok = mask_token.reshape(1, D).astype(jnp.float32)   # (1, D)
    pos = pos_enc[:Lf, :].astype(jnp.float32)             # (Lf, D), static slice

    vmem = pl.BlockSpec(memory_space=pltpu.MemorySpace.VMEM)
    return pl.pallas_call(
        revert_kernel,
        out_shape=jax.ShapeDtypeStruct((B, Lf, D), jnp.float32),
        in_specs=[vmem, vmem, vmem, vmem, vmem],
        out_specs=vmem,
    )(val.astype(jnp.float32), keep, idx, mtok, pos)


# ---------------------------------------------------------------------------
# Pure-JAX reference (mirrors the torch code op-for-op).
# ---------------------------------------------------------------------------
def revert_ref(key, val, padding_mask_dict, idx_dict, mask_token, pos_enc):
    B, Lr, D = val.shape
    mask = padding_mask_dict[f"{key}_remain_padding_mask"]
    val = jnp.where((mask == 1)[:, :, None], val, mask_token[None, None, :])
    revert_idx = idx_dict[f"{key}_revert_idx"]
    Lf = revert_idx.shape[1]
    pad = jnp.broadcast_to(mask_token[None, None, :], (B, Lf - Lr, D))
    full = jnp.concatenate([val, pad], axis=1)                       # (B, Lf, D)
    gathered = jnp.take_along_axis(full, revert_idx[:, :, None].astype(jnp.int32), axis=1)
    return gathered + pos_enc[:Lf, :][None, :, :]


# ---------------------------------------------------------------------------
# Deterministic example
# ---------------------------------------------------------------------------
if __name__ == "__main__":
    rng = jax.random.PRNGKey(0)
    B, Lr, Lf, D = 2, 8, 16, 32          # batch, remaining seq, full seq, d_model
    MAX_LEN = 64

    k1, k2, k3, k4 = jax.random.split(rng, 4)
    val = jax.random.normal(k1, (B, Lr, D), jnp.float32)
    mask_token = jax.random.normal(k2, (D,), jnp.float32)
    pos_enc = jax.random.normal(k3, (MAX_LEN, D), jnp.float32)

    # remain_padding_mask: 1 = kept token, 0 = replace with mask_token (torch `== 1` test)
    remain_mask = jnp.ones((B, Lr), jnp.int32).at[:, -2:].set(0)
    # revert_idx: per-batch permutation of [0, Lf) mapping shuffled order back to original
    revert_idx = jnp.stack(
        [jax.random.permutation(jax.random.fold_in(k4, b), Lf) for b in range(B)]
    ).astype(jnp.int32)

    padding_mask_dict = {"target_remain_padding_mask": remain_mask}
    idx_dict = {"target_revert_idx": revert_idx}

    out = revert_pallas("target", val, padding_mask_dict, idx_dict, mask_token, pos_enc)
    out = jax.block_until_ready(out)

    ref = revert_ref("target", val, padding_mask_dict, idx_dict, mask_token, pos_enc)
    assert out.shape == (B, Lf, D)
    assert jnp.allclose(out, ref, atol=1e-5, rtol=1e-5)

    print("KERNEL_OK")
</pallas_src>

<mosaic_0001>
module attributes {stable_mosaic.version = 11 : i64} {
  func.func @revert_kernel(%arg0: memref<2x8x32xf32, #tpu.memory_space<vmem>>, %arg1: memref<2x8xf32, #tpu.memory_space<vmem>>, %arg2: memref<2x16xi32, #tpu.memory_space<vmem>>, %arg3: memref<1x32xf32, #tpu.memory_space<vmem>>, %arg4: memref<16x32xf32, #tpu.memory_space<vmem>>, %arg5: memref<2x16x32xf32, #tpu.memory_space<vmem>>) attributes {dimension_semantics = [], scalar_prefetch = 0 : i64, scratch_operands = 0 : i64, tpu.core_type = #tpu.core_type<tc>} {
    %c0 = arith.constant 0 : index
    %c0_0 = arith.constant 0 : index
    %c0_1 = arith.constant 0 : index
    %0 = vector.load %arg0[%c0, %c0_0, %c0_1] : memref<2x8x32xf32, #tpu.memory_space<vmem>>, vector<2x8x32xf32>
    %c0_2 = arith.constant 0 : index
    %c0_3 = arith.constant 0 : index
    %1 = vector.load %arg1[%c0_2, %c0_3] : memref<2x8xf32, #tpu.memory_space<vmem>>, vector<2x8xf32>
    %c0_4 = arith.constant 0 : index
    %c0_5 = arith.constant 0 : index
    %2 = vector.load %arg2[%c0_4, %c0_5] : memref<2x16xi32, #tpu.memory_space<vmem>>, vector<2x16xi32>
    %c0_6 = arith.constant 0 : index
    %c0_7 = arith.constant 0 : index
    %3 = vector.load %arg3[%c0_6, %c0_7] : memref<1x32xf32, #tpu.memory_space<vmem>>, vector<1x32xf32>
    %c0_8 = arith.constant 0 : index
    %c0_9 = arith.constant 0 : index
    %4 = vector.load %arg4[%c0_8, %c0_9] : memref<16x32xf32, #tpu.memory_space<vmem>>, vector<16x32xf32>
    %5 = tpu.iota {dimensions = array<i32: 2>} : vector<2x16x8xi32>
    %6 = vector.shape_cast %2 : vector<2x16xi32> to vector<2x16x1xi32>
    %7 = vector.broadcast %6 : vector<2x16x1xi32> to vector<2x16x8xi32>
    %8 = arith.cmpi eq, %7, %5 : vector<2x16x8xi32>
    %9 = arith.extui %8 : vector<2x16x8xi1> to vector<2x16x8xi32>
    %10 = arith.sitofp %9 : vector<2x16x8xi32> to vector<2x16x8xf32>
    %11 = vector.shape_cast %1 : vector<2x8xf32> to vector<2x1x8xf32>
    %12 = vector.broadcast %11 : vector<2x1x8xf32> to vector<2x16x8xf32>
    %13 = arith.mulf %10, %12 : vector<2x16x8xf32>
    "tpu.trace_start"() <{level = 10 : i32, message = "bji,bid->bjd"}> : () -> ()
    %cst = arith.constant dense<0.000000e+00> : vector<2x16x32xf32>
    %14 = tpu.matmul %13, %0, %cst {dimension_numbers = #tpu.dot_dimension_numbers<[2], [1], [1], [2], [0, 0, 0, 1, 1, 2], [0], [0]>} : vector<2x16x8xf32>, vector<2x8x32xf32>, vector<2x16x32xf32> -> vector<2x16x32xf32>
    "tpu.trace_stop"() : () -> ()
    %cst_10 = arith.constant dense<0.000000e+00> : vector<2x16xf32>
    %15 = vector.multi_reduction <add>, %13, %cst_10 [2] : vector<2x16x8xf32> to vector<2x16xf32>
    %16 = vector.shape_cast %15 : vector<2x16xf32> to vector<2x16x1xf32>
    %cst_11 = arith.constant 1.000000e+00 : f32
    %17 = vector.broadcast %cst_11 : f32 to vector<2x16x1xf32>
    %18 = arith.subf %17, %16 : vector<2x16x1xf32>
    %19 = vector.shape_cast %3 : vector<1x32xf32> to vector<1x1x32xf32>
    %20 = vector.broadcast %18 : vector<2x16x1xf32> to vector<2x16x32xf32>
    %21 = vector.broadcast %19 : vector<1x1x32xf32> to vector<2x16x32xf32>
    %22 = arith.mulf %20, %21 : vector<2x16x32xf32>
    %23 = arith.addf %14, %22 : vector<2x16x32xf32>
    %24 = vector.shape_cast %4 : vector<16x32xf32> to vector<1x16x32xf32>
    %25 = vector.broadcast %24 : vector<1x16x32xf32> to vector<2x16x32xf32>
    %26 = arith.addf %23, %25 : vector<2x16x32xf32>
    %c0_12 = arith.constant 0 : index
    %c0_13 = arith.constant 0 : index
    %c0_14 = arith.constant 0 : index
    %27 = vector.load %arg5[%c0_12, %c0_13, %c0_14] : memref<2x16x32xf32, #tpu.memory_space<vmem>>, vector<2x16x32xf32>
    tpu.vector_store %arg5[%c0_12, %c0_13, %c0_14], %26 {strides = array<i32>} : memref<2x16x32xf32, #tpu.memory_space<vmem>>, vector<2x16x32xf32>,
    return
  }
}

</mosaic_0001>

<bundles_post_ra>
// kernel: tpu_custom_call.1
= control target key start
LH: loop header
LB: loop body
LE: loop exit
PB: predicated region body
PF: predicated region fallthrough
CT: control target
= control target key end

     0   :  { %10 = vsyncpa [#allocation3], 0  ;;  %s553_s0 = inlined_call_operand.hbm [shape: f32[2,8,32], index: 0, kind: input, shape index: {}]   ;;  %s554_s1 = inlined_call_operand.hbm [shape: f32[2,8], index: 1, kind: input, shape index: {}]   ;;  %s555_s2 = inlined_call_operand.vmem [shape: s32[2,16], index: 2, kind: input, shape index: {}]   ;;  %s556_s3 = inlined_call_operand.vmem [shape: f32[1,32], index: 3, kind: input, shape index: {}]   ;;  %s557_s4 = inlined_call_operand.hbm [shape: f32[16,32], index: 4, kind: input, shape index: {}]   ;;  %s558_s5 = inlined_call_operand.hbm [shape: f32[2,16,32], index: 5, kind: output, shape index: {}]  }
   0x1   :  { %11 = vsyncpa [#allocation6], 0 }
   0x2   :  { %12 = vsyncpa [#allocation4], 0  ;;  %s476_s18 = smov [#allocation5]   ;;  %s477_s20 = smov [#allocation2]  }
   0x3   :  { %s31_s19 = sshll.u32 %s476_s18, 4  ;;  %s18_s21 = sshll.u32 %s477_s20, 4  ;;  %s32_s19 = int_to_ptr.vmem [resolvable:$true] %s31_s19  ;;  %s19_s21 = int_to_ptr.vmem [resolvable:$true] %s18_s21 }
   0x4   :  { %s398_s22 = scalar_lea.vmem %s32_s19, 32  ;;  %p403_p1 = scmp.lt.s32.totalorder %s32_s19, %s32_s19 }
   0x5   :  { %p399_p0 = scmp.ne.s32.totalorder %s32_s19, %s398_s22  ;;  %p404_p2 = scmp.lt.s32.totalorder %s398_s22, %s398_s22 }
   0x7   :  { %p405_p3 = por %p404_p2, %p403_p1 }
   0x9   :  { %p406_p4 = pnand %p405_p3, %p399_p0 }
   0xb   :  { %409 = shalt.err (!%p406_p4)
}
   0xc   :  { %34 = dma.hbm_to_vmem [thread:$0]  %s554_s1, 32, %s32_s19, [#allocation6]  }
   0xd   :  { %s418_s25 = scalar_lea.vmem %s19_s21, 256  ;;  %p423_p6 = scmp.lt.s32.totalorder %s19_s21, %s19_s21 }
   0xe   :  { %p419_p5 = scmp.ne.s32.totalorder %s19_s21, %s418_s25  ;;  %p424_p7 = scmp.lt.s32.totalorder %s418_s25, %s418_s25 }
  0x10   :  { %p425_p8 = por %p424_p7, %p423_p6 }
  0x12   :  { %p426_p9 = pnand %p425_p8, %p419_p5 }
  0x14   :  { %429 = shalt.err (!%p426_p9)
}
  0x15   :  { %s478_s26 = smov 128   ;;  %s479_s27 = smov 8  }
  0x16   :  { %24 = dma.hbm_to_vmem [thread:$0]  %s553_s0, 256, %s19_s21, [#allocation3], %s478_s26, %s478_s26, %s479_s27  }
  0x17   :  { %s480_s30 = smov [#allocation7]  }
  0x18   :  { %s44_s6 = sshll.u32 %s480_s30, 4  ;;  %s45_s6 = int_to_ptr.vmem [resolvable:$true] %s44_s6 }
  0x19   :  { %s438_s1 = scalar_lea.vmem %s45_s6, 256  ;;  %p443_p11 = scmp.lt.s32.totalorder %s45_s6, %s45_s6 }
  0x1a   :  { %p439_p10 = scmp.ne.s32.totalorder %s45_s6, %s438_s1  ;;  %p444_p12 = scmp.lt.s32.totalorder %s438_s1, %s438_s1 }
  0x1c   :  { %p445_p13 = por %p444_p12, %p443_p11 }
  0x1e   :  { %p446_p0 = pnand %p445_p13, %p439_p10 }
  0x20   :  { %449 = shalt.err (!%p446_p0)
}
  0x21   :  { %50 = dma.hbm_to_vmem [thread:$0]  %s557_s4, 256, %s45_s6, [#allocation6], %s478_s26, %s478_s26, %s479_s27  }
  0x22   :  { %470 = dma.done.wait [#allocation3], 256  }
  0x23   :  { %471 = vsyncadd [#allocation3], 4294967040 }
  0x24   :  { %472 = dma.done.wait [#allocation6], 288  }
  0x25   :  { %473 = vsyncadd [#allocation6], 4294967008  ;;  %v67_v0 = vlaneseq  ;;  %v481_v1 = vmov 1966171168   ;;  %v63_v8 = vld [vmem:[%s555_s2] sm:$0x3] }
  0x26   :  { %v113_v2 = vunpack.c.l.s4 %v481_v1  ;;  %v360_v9 = vld.sshfl [vmem:[#allocation5] sm:$0x11 pattern:$0x75316420]  ;;  %v60_v12 = vld [vmem:[#allocation2] sm:$0xff]  ;;  %v61_v14 = vld [vmem:[#allocation2 + $0x8] sm:$0xff] }
  0x27   :  { %v70_v3 = vshrl.u32 %v67_v0, 7  ;;  %v111_v13 = vcombine.high %v360_v9, %v360_v9  ;;  %372 = vmatprep.subr.mxu0 %v60_v12  ;;  %377 = vmatprep.subr.mxu1 %v61_v14  ;;  %v68_v19 = vand.u32 127, %v67_v0  ;;  %v482_v22 = vmov 0.0   ;;  %v361_v41 = vld [vmem:[%s556_s3] ss:$0 sm:$0xff]  ;;  %v65_v51 = vld [vmem:[#allocation7] sm:$0xff] }
  0x28   :  { %v114_v4 = vunpack.c.0.s8 %v113_v2  ;;  %373 = vmatpush3.msra.mxu0 %v60_v12  ;;  %378 = vmatpush3.msra.mxu1 %v61_v14  ;;  %vm140_vm2 = vcmask 64512   ;;  %v66_v46 = vld [vmem:[#allocation7 + $0x8] sm:$0xff]  ;;  %vm333_vm5 = vcmask 261120   ;;  %s483_s3 = smov [#allocation8]  }
  0x29   :  { %v71_v5 = vsub.s32 0, %v70_v3  ;;  %v82_v7 = vsub.s32 1, %v70_v3  ;;  %s343_s10 = sshll.u32 %s483_s3, 4  ;;  %s344_s10 = int_to_ptr.vmem [resolvable:$true] %s343_s10 }
  0x2a   :  { %v117_v6 = vsub.s32 %v114_v4, %v70_v3  ;;  %s450_s11 = scalar_lea.vmem %s344_s10, 512  ;;  %p455_p2 = scmp.lt.s32.totalorder %s344_s10, %s344_s10 }
  0x2b   :  { %v72_v10 = vrot.slane %v63_v8, %v71_v5  ;;  %v83_v15 = vrot.slane %v63_v8, %v82_v7  ;;  %p451_p1 = scmp.ne.s32.totalorder %s344_s10, %s450_s11  ;;  %p456_p3 = scmp.lt.s32.totalorder %s450_s11, %s450_s11 }
  0x2c   :  { %v118_v11 = vrot.slane %v360_v9, %v117_v6  ;;  %v125_v17 = vrot.slane %v111_v13, %v117_v6 }
  0x2d   :  { %74 = vbcast.lane.b32.xlu0 %v72_v10, 256  ;;  %78 = vbcast.lane.b32.xlu1 %v72_v10, 264  ;;  %p457_p4 = por %p456_p3, %p455_p2 }
  0x2e   :  { %v129_v16 = vrot.slane %v118_v11, %v71_v5  ;;  %v133_v18 = vrot.slane %v125_v17, %v71_v5 }
  0x2f   :  { %p458_p5 = pnand %p457_p4, %p451_p1 }
  0x31   :  { %85 = vbcast.lane.b32.xlu0 %v83_v15, 256  ;;  %89 = vbcast.lane.b32.xlu1 %v83_v15, 264 }
  0x9f   :  { %v75_v20 = vpop.permute.xlu0 %74  ;;  %v79_v21 = vpop.permute.xlu1 %78 }
  0xa0   :  { %vm91_vm0 = vcmp.eq.s32.totalorder %v75_v20, %v68_v19  ;;  %vm92_vm1 = vcmp.eq.s32.totalorder %v79_v21, %v68_v19 }
  0xa1   :  { %v356_v23 = vsel %vm91_vm0, 1.0, %v482_v22  ;;  %v357_v24 = vsel %vm92_vm1, 1.0, %v482_v22 }
  0xa2   :  { %v137_v25 = vmul.f32 %v357_v24, %v129_v16  ;;  %v136_v26 = vmul.f32 %v356_v23, %v129_v16 }
  0xa3   :  { %v86_v27 = vpop.permute.xlu0 %85  ;;  %v90_v28 = vpop.permute.xlu1 %89 }
  0xa4   :  { %vm93_vm3 = vcmp.eq.s32.totalorder %v86_v27, %v68_v19  ;;  %vm94_vm4 = vcmp.eq.s32.totalorder %v90_v28, %v68_v19  ;;  %374 = vmatprep.mubr.msk.f32.mxu0 %vm140_vm2, %v136_v26  ;;  %v141_v29 = vsel %vm140_vm2, %v136_v26, 0.0  ;;  %v144_v30 = vsel %vm140_vm2, %v137_v25, 0.0 }
  0xa5   :  { %v358_v31 = vsel %vm93_vm3, 1.0, %v482_v22  ;;  %v359_v32 = vsel %vm94_vm4, 1.0, %v482_v22  ;;  %142 = vadd.xlane.f32.xlu0 %v141_v29  ;;  %375 = vmatmul.mubr.msk.f32.vlgmr.msra.gmra.mxu0 %vm140_vm2, %v137_v25 }
  0xa6   :  { %v139_v33 = vmul.f32 %v359_v32, %v133_v18  ;;  %145 = vadd.xlane.f32.xlu1 %v144_v30  ;;  %v138_v34 = vmul.f32 %v358_v31, %v133_v18 }
  0xa8   :  { %379 = vmatprep.mubr.msk.f32.mxu1 %vm140_vm2, %v138_v34  ;;  %v147_v35 = vsel %vm140_vm2, %v138_v34, 0.0  ;;  %v150_v36 = vsel %vm140_vm2, %v139_v33, 0.0 }
  0xa9   :  { %148 = vadd.xlane.f32.xlu0 %v147_v35  ;;  %380 = vmatmul.mubr.msk.f32.vlgmr.msra.gmra.mxu1 %vm140_vm2, %v139_v33 }
  0xad   :  { %151 = vadd.xlane.f32.xlu0 %v150_v36 }
 0x12e   :  { %v143_v37 = vpop.xlane.xlu0 %142 }
 0x12f   :  { %v146_v39 = vpop.xlane.xlu1 %145  ;;  %v153_v43 = vsub.f32 1.0, %v143_v37 }
 0x130   :  { %v154_v40 = vsub.f32 1.0, %v146_v39 }
 0x131   :  { %v163_v50 = vmul.f32 %v361_v41, %v153_v43 }
 0x132   :  { %v149_v38 = vpop.xlane.xlu0 %148  ;;  %v164_v44 = vmul.f32 %v361_v41, %v154_v40 }
 0x133   :  { %v155_v48 = vsub.f32 1.0, %v149_v38 }
 0x135   :  { %v165_v59 = vmul.f32 %v361_v41, %v155_v48 }
 0x136   :  { %v152_v42 = vpop.xlane.xlu0 %151 }
 0x137   :  { %v156_v45 = vsub.f32 1.0, %v152_v42 }
 0x139   :  { %v166_v53 = vmul.f32 %v361_v41, %v156_v45 }
 0x165   :  { %v376_v47 = vpop.f32.mrf.mxu0 }
 0x166   :  { %v245_v49 = vadd.f32 %v376_v47, %v164_v44 }
 0x167   :  { %v239_v52 = vpop.f32.mrf.mxu0 }
 0x168   :  { %v330_v54 = vadd.f32 %v245_v49, %v66_v46  ;;  %v240_v55 = vadd.f32 %v239_v52, %v163_v50 }
 0x169   :  { %v381_v56 = vpop.f32.mrf.mxu1 }
 0x16a   :  { %335 = vst.msk [vmem:[#allocation8 + $0x8] sm:$0xff] %vm333_vm5, %v330_v54  ;;  %v329_v57 = vadd.f32 %v240_v55, %v65_v51  ;;  %v326_v58 = vadd.f32 %v381_v56, %v166_v53 }
 0x16b   :  { %v320_v60 = vpop.f32.mrf.mxu1 }
 0x16c   :  { %334 = vst.msk [vmem:[#allocation8] sm:$0xff] %vm333_vm5, %v329_v57  ;;  %v332_v61 = vadd.f32 %v326_v58, %v66_v46  ;;  %v321_v62 = vadd.f32 %v320_v60, %v165_v59 }
 0x16e   :  { %337 = vst.msk [vmem:[#allocation8 + $0x18] sm:$0xff] %vm333_vm5, %v332_v61  ;;  %v331_v63 = vadd.f32 %v321_v62, %v65_v51 }
 0x170   :  { %336 = vst.msk [vmem:[#allocation8 + $0x10] sm:$0xff] %vm333_vm5, %v331_v63 }
 0x171   :  { %461 = shalt.err (!%p458_p5)
}
 0x172   :  { %349 = dma.vmem_to_hbm [thread:$0]  %s344_s10, 512, %s558_s5, [#allocation4], %s478_s26, %s478_s26, %s479_s27  }
 0x173   :  { %474 = dma.done.wait [#allocation4], 512  }
 0x174   :  { %475 = vsyncadd [#allocation4], 4294966784 }
 0x175   :  { %353 = vsyncpa [#allocation3], 1 }
 0x176   :  { %354 = vsyncpa [#allocation6], 1 }
 0x177   :  { %355 = vsyncpa [#allocation4], 1 }

</bundles_post_ra>
